<compile_context>
chip_gen: v7x
topology: tpu7x:2x2x1
jax: 0.10.0
libtpu: 0.0.40
codegen_flags: <defaults>
</compile_context>

<pallas_src>
import jax
import jax.numpy as jnp
from jax import lax
from jax.experimental import pallas as pl
from jax.experimental.pallas import tpu as pltpu

LANE = 128


def _round_up(x, m):
    return ((x + m - 1) // m) * m


# ---------------------------------------------------------------------------
# Fused Pallas kernel:  h = LSTM(x)[-1];  out = relu(h @ Wout + bout)
# ---------------------------------------------------------------------------
def _r2n_lstm_kernel(x_ref, wih_ref, whh_ref, bg_ref, wout_ref, bout_ref,
                     o_ref, h_ref, c_ref):
    L = x_ref.shape[0]
    H = whh_ref.shape[0]

    h_ref[...] = jnp.zeros_like(h_ref)
    c_ref[...] = jnp.zeros_like(c_ref)

    @pl.loop(0, L)
    def _(t):
        xt = x_ref[t]                                     # [B, I]
        h_prev = h_ref[...]                               # [B, H]
        gates = (jnp.dot(xt, wih_ref[...], preferred_element_type=jnp.float32)
                 + jnp.dot(h_prev, whh_ref[...], preferred_element_type=jnp.float32)
                 + bg_ref[...])                           # [B, 4H] (lane-dense, 4H=128)
        i_g = jax.nn.sigmoid(gates[:, 0 * H:1 * H])
        f_g = jax.nn.sigmoid(gates[:, 1 * H:2 * H])
        g_g = jnp.tanh(gates[:, 2 * H:3 * H])
        o_g = jax.nn.sigmoid(gates[:, 3 * H:4 * H])
        c_new = f_g * c_ref[...] + i_g * g_g
        c_ref[...] = c_new
        h_ref[...] = o_g * jnp.tanh(c_new)

    out = (jnp.dot(h_ref[...], wout_ref[...], preferred_element_type=jnp.float32)
           + bout_ref[...])
    o_ref[...] = jnp.maximum(out, 0.0).astype(o_ref.dtype)


def lstm_linear_relu(x, wih, whh, b_gate, wout_p, bout_p):
    """x [L,B,I], wih [I,4H], whh [H,4H], b_gate [1,4H], wout_p [H,Np], bout_p [1,Np]."""
    L, B, I = x.shape
    H, H4 = whh.shape
    Np = wout_p.shape[1]
    return pl.pallas_call(
        _r2n_lstm_kernel,
        out_shape=jax.ShapeDtypeStruct((B, Np), jnp.float32),
        grid=(1,),
        in_specs=[
            pl.BlockSpec((L, B, I), lambda i: (0, 0, 0)),
            pl.BlockSpec((I, H4), lambda i: (0, 0)),
            pl.BlockSpec((H, H4), lambda i: (0, 0)),
            pl.BlockSpec((1, H4), lambda i: (0, 0)),
            pl.BlockSpec((H, Np), lambda i: (0, 0)),
            pl.BlockSpec((1, Np), lambda i: (0, 0)),
        ],
        out_specs=pl.BlockSpec((B, Np), lambda i: (0, 0)),
        scratch_shapes=[pltpu.VMEM((B, H), jnp.float32),   # h state
                        pltpu.VMEM((B, H), jnp.float32)],  # c state
        compiler_params=pltpu.CompilerParams(
            dimension_semantics=("arbitrary",)),
    )(x, wih, whh, b_gate, wout_p, bout_p)


# ---------------------------------------------------------------------------
# Parameter construction (deterministic, mirrors R2NModule.__init__)
# ---------------------------------------------------------------------------
def init_params(key, cat_dims, emb_dims, cont_dim, n_hidden):
    cat_dims = [int(c) + 1 for c in cat_dims]            # module does `cat_dims += 1`
    n_input = int(sum(emb_dims) + cont_dim)
    H = int(n_hidden)

    keys = jax.random.split(key, 6 + len(cat_dims))
    emb_tables = [
        0.1 * jax.random.normal(keys[i], (cat_dims[i], emb_dims[i]), jnp.float32)
        for i in range(len(cat_dims))
    ]
    # nn.LSTM(n_input, H): W_ih [4H, I], W_hh [4H, H], b_ih [4H], b_hh [4H]
    w_ih = 0.1 * jax.random.normal(keys[-6], (4 * H, n_input), jnp.float32)
    w_hh = 0.1 * jax.random.normal(keys[-5], (4 * H, H), jnp.float32)
    b_ih = 0.1 * jax.random.normal(keys[-4], (4 * H,), jnp.float32)
    b_hh = 0.1 * jax.random.normal(keys[-3], (4 * H,), jnp.float32)
    # nn.Linear(H, H): W [H, H], b [H]
    w_lin = 0.1 * jax.random.normal(keys[-2], (H, H), jnp.float32)
    b_lin = 0.1 * jax.random.normal(keys[-1], (H,), jnp.float32)

    # Kernel-form weights (transposed; output lane-padded to a multiple of 128).
    Np = _round_up(H, LANE)
    wout_p = jnp.zeros((H, Np), jnp.float32).at[:, :H].set(w_lin.T)
    bout_p = jnp.zeros((1, Np), jnp.float32).at[:, :H].set(b_lin)

    return {
        # PyTorch-layout params (used by the pure-JAX reference)
        "w_ih": w_ih, "w_hh": w_hh, "b_ih": b_ih, "b_hh": b_hh,
        "w_lin": w_lin, "b_lin": b_lin,
        "emb_tables": emb_tables,
        # kernel-layout params
        "wih_t": jnp.transpose(w_ih),                    # [I, 4H]
        "whh_t": jnp.transpose(w_hh),                    # [H, 4H]
        "b_gate": (b_ih + b_hh).reshape(1, 4 * H),       # [1, 4H]
        "wout_p": wout_p, "bout_p": bout_p,              # [H, Np], [1, Np]
    }


# ---------------------------------------------------------------------------
# Whole forward pass as one jitted program (gather/concat glue + fused kernel)
# ---------------------------------------------------------------------------
@jax.jit
def r2n_forward(params, cat, cont):
    embs = [tbl[cat[:, :, i]] for i, tbl in enumerate(params["emb_tables"])]
    x = jnp.concatenate(embs + [cont], axis=2)           # [B, L, n_input]
    x = jnp.transpose(x, (1, 0, 2))                      # [L, B, n_input]  (x.transpose(0,1))
    H = params["b_lin"].shape[0]
    out_p = lstm_linear_relu(x, params["wih_t"], params["whh_t"], params["b_gate"],
                             params["wout_p"], params["bout_p"])   # [B, Np]
    return out_p[:, :H]                                  # [B, H]


# ---------------------------------------------------------------------------
# Pure-JAX reference implementing the PyTorch semantics directly
# ---------------------------------------------------------------------------
def r2n_reference(params, cat, cont):
    embs = [tbl[cat[:, :, i]] for i, tbl in enumerate(params["emb_tables"])]
    x = jnp.concatenate(embs + [cont], axis=2)           # [B, L, I]
    x = jnp.transpose(x, (1, 0, 2))                      # [L, B, I]
    H = params["b_lin"].shape[0]
    B = x.shape[1]

    def step(carry, xt):
        h, c = carry
        gates = (xt @ params["w_ih"].T + params["b_ih"]
                 + h @ params["w_hh"].T + params["b_hh"])
        i = jax.nn.sigmoid(gates[:, 0 * H:1 * H])
        f = jax.nn.sigmoid(gates[:, 1 * H:2 * H])
        g = jnp.tanh(gates[:, 2 * H:3 * H])
        o = jax.nn.sigmoid(gates[:, 3 * H:4 * H])
        c = f * c + i * g
        h = o * jnp.tanh(c)
        return (h, c), None

    h0 = jnp.zeros((B, H), jnp.float32)
    c0 = jnp.zeros((B, H), jnp.float32)
    (h, _), _ = lax.scan(step, (h0, c0), x)
    return jax.nn.relu(h @ params["w_lin"].T + params["b_lin"])


if __name__ == "__main__":
    key = jax.random.PRNGKey(0)

    # diminfo = (cat_dims, emb_dims, cont_dim)
    cat_dims = [7, 11]          # raw cardinalities (module adds +1)
    emb_dims = [3, 5]
    cont_dim = 8
    n_hidden = 32
    B, L = 2, 8

    k_par, k_cat0, k_cat1, k_cont = jax.random.split(key, 4)
    params = init_params(k_par, cat_dims, emb_dims, cont_dim, n_hidden)

    cat = jnp.stack(
        [
            jax.random.randint(k_cat0, (B, L), 0, cat_dims[0] + 1, dtype=jnp.int32),
            jax.random.randint(k_cat1, (B, L), 0, cat_dims[1] + 1, dtype=jnp.int32),
        ],
        axis=2,
    )                                                    # [B, L, 2] int32
    cont = jax.random.normal(k_cont, (B, L, cont_dim), jnp.float32)   # [B, L, 8]

    out = jax.block_until_ready(r2n_forward(params, cat, cont))
    ref = jax.block_until_ready(r2n_reference(params, cat, cont))

    assert out.shape == (B, n_hidden), out.shape
    assert jnp.allclose(out, ref, atol=2e-4, rtol=2e-4), float(jnp.max(jnp.abs(out - ref)))

    print("KERNEL_OK")
</pallas_src>

<mosaic_0001>
module attributes {stable_mosaic.version = 11 : i64} {
  func.func @_r2n_lstm_kernel(%arg0: i32, %arg1: memref<8x2x16xf32, #tpu.memory_space<vmem>>, %arg2: memref<16x128xf32, #tpu.memory_space<vmem>>, %arg3: memref<32x128xf32, #tpu.memory_space<vmem>>, %arg4: memref<1x128xf32, #tpu.memory_space<vmem>>, %arg5: memref<32x128xf32, #tpu.memory_space<vmem>>, %arg6: memref<1x128xf32, #tpu.memory_space<vmem>>, %arg7: memref<2x128xf32, #tpu.memory_space<vmem>>, %arg8: memref<2x32xf32, #tpu.memory_space<vmem>>, %arg9: memref<2x32xf32, #tpu.memory_space<vmem>>) attributes {dimension_semantics = [#tpu.dimension_semantics<arbitrary>], iteration_bounds = array<i64: 1>, scalar_prefetch = 0 : i64, scratch_operands = 2 : i64, tpu.core_type = #tpu.core_type<tc>, window_params = [{pipeline_mode = #tpu.pipeline_mode<synchronous>, transform_indices = @transform_0, window_bounds = array<i64: 8, 2, 16>}, {pipeline_mode = #tpu.pipeline_mode<synchronous>, transform_indices = @transform_1, window_bounds = array<i64: 16, 128>}, {pipeline_mode = #tpu.pipeline_mode<synchronous>, transform_indices = @transform_2, window_bounds = array<i64: 32, 128>}, {pipeline_mode = #tpu.pipeline_mode<synchronous>, transform_indices = @transform_3, window_bounds = array<i64: 1, 128>}, {pipeline_mode = #tpu.pipeline_mode<synchronous>, transform_indices = @transform_4, window_bounds = array<i64: 32, 128>}, {pipeline_mode = #tpu.pipeline_mode<synchronous>, transform_indices = @transform_5, window_bounds = array<i64: 1, 128>}, {pipeline_mode = #tpu.pipeline_mode<synchronous>, transform_indices = @transform_6, window_bounds = array<i64: 2, 128>}]} {
    %cst = arith.constant 0.000000e+00 : f32
    %0 = vector.broadcast %cst : f32 to vector<2x32xf32>
    %c0 = arith.constant 0 : index
    %c0_0 = arith.constant 0 : index
    %1 = vector.load %arg8[%c0, %c0_0] : memref<2x32xf32, #tpu.memory_space<vmem>>, vector<2x32xf32>
    tpu.vector_store %arg8[%c0, %c0_0], %0 {strides = array<i32>} : memref<2x32xf32, #tpu.memory_space<vmem>>, vector<2x32xf32>,
    %cst_1 = arith.constant 0.000000e+00 : f32
    %2 = vector.broadcast %cst_1 : f32 to vector<2x32xf32>
    %c0_2 = arith.constant 0 : index
    %c0_3 = arith.constant 0 : index
    %3 = vector.load %arg9[%c0_2, %c0_3] : memref<2x32xf32, #tpu.memory_space<vmem>>, vector<2x32xf32>
    tpu.vector_store %arg9[%c0_2, %c0_3], %2 {strides = array<i32>} : memref<2x32xf32, #tpu.memory_space<vmem>>, vector<2x32xf32>,
    %c0_i32 = arith.constant 0 : i32
    %c8_i32 = arith.constant 8 : i32
    %4 = arith.addi %c0_i32, %c8_i32 : i32
    %c1_i32 = arith.constant 1 : i32
    scf.for %arg10 = %c0_i32 to %4 step %c1_i32  : i32 {
      %c1_i32_15 = arith.constant 1 : i32
      %14 = arith.muli %arg10, %c1_i32_15 : i32
      %c0_i32_16 = arith.constant 0 : i32
      %15 = arith.addi %c0_i32_16, %14 : i32
      %16 = arith.index_cast %15 : i32 to index
      %c0_17 = arith.constant 0 : index
      %c0_18 = arith.constant 0 : index
      %17 = vector.load %arg1[%16, %c0_17, %c0_18] : memref<8x2x16xf32, #tpu.memory_space<vmem>>, vector<1x2x16xf32>
      %18 = vector.shape_cast %17 : vector<1x2x16xf32> to vector<2x16xf32>
      %c0_19 = arith.constant 0 : index
      %c0_20 = arith.constant 0 : index
      %19 = vector.load %arg8[%c0_19, %c0_20] : memref<2x32xf32, #tpu.memory_space<vmem>>, vector<2x32xf32>
      %c0_21 = arith.constant 0 : index
      %c0_22 = arith.constant 0 : index
      %20 = vector.load %arg2[%c0_21, %c0_22] : memref<16x128xf32, #tpu.memory_space<vmem>>, vector<16x128xf32>
      %cst_23 = arith.constant dense<0.000000e+00> : vector<2x128xf32>
      %21 = tpu.matmul %18, %20, %cst_23 {dimension_numbers = #tpu.dot_dimension_numbers<[1], [0], [0], [1], [0, 0, 1, 1], [], []>} : vector<2x16xf32>, vector<16x128xf32>, vector<2x128xf32> -> vector<2x128xf32>
      %c0_24 = arith.constant 0 : index
      %c0_25 = arith.constant 0 : index
      %22 = vector.load %arg3[%c0_24, %c0_25] : memref<32x128xf32, #tpu.memory_space<vmem>>, vector<32x128xf32>
      %cst_26 = arith.constant dense<0.000000e+00> : vector<2x128xf32>
      %23 = tpu.matmul %19, %22, %cst_26 {dimension_numbers = #tpu.dot_dimension_numbers<[1], [0], [0], [1], [0, 0, 1, 1], [], []>} : vector<2x32xf32>, vector<32x128xf32>, vector<2x128xf32> -> vector<2x128xf32>
      %24 = arith.addf %21, %23 : vector<2x128xf32>
      %c0_27 = arith.constant 0 : index
      %c0_28 = arith.constant 0 : index
      %25 = vector.load %arg4[%c0_27, %c0_28] : memref<1x128xf32, #tpu.memory_space<vmem>>, vector<1x128xf32>
      %26 = vector.broadcast %25 : vector<1x128xf32> to vector<2x128xf32>
      %27 = arith.addf %24, %26 : vector<2x128xf32>
      %28 = vector.extract_strided_slice %27 {offsets = [0, 0], sizes = [2, 32], strides = [1, 1]} : vector<2x128xf32> to vector<2x32xf32>
      %29 = arith.negf %28 : vector<2x32xf32>
      %30 = math.exp %29 : vector<2x32xf32>
      %cst_29 = arith.constant 1.000000e+00 : f32
      %31 = vector.broadcast %cst_29 : f32 to vector<2x32xf32>
      %32 = arith.addf %31, %30 : vector<2x32xf32>
      %33 = arith.divf %31, %32 : vector<2x32xf32>
      %34 = vector.extract_strided_slice %27 {offsets = [0, 32], sizes = [2, 32], strides = [1, 1]} : vector<2x128xf32> to vector<2x32xf32>
      %35 = arith.negf %34 : vector<2x32xf32>
      %36 = math.exp %35 : vector<2x32xf32>
      %cst_30 = arith.constant 1.000000e+00 : f32
      %37 = vector.broadcast %cst_30 : f32 to vector<2x32xf32>
      %38 = arith.addf %37, %36 : vector<2x32xf32>
      %39 = arith.divf %37, %38 : vector<2x32xf32>
      %40 = vector.extract_strided_slice %27 {offsets = [0, 64], sizes = [2, 32], strides = [1, 1]} : vector<2x128xf32> to vector<2x32xf32>
      %41 = math.tanh %40 : vector<2x32xf32>
      %42 = vector.extract_strided_slice %27 {offsets = [0, 96], sizes = [2, 32], strides = [1, 1]} : vector<2x128xf32> to vector<2x32xf32>
      %43 = arith.negf %42 : vector<2x32xf32>
      %44 = math.exp %43 : vector<2x32xf32>
      %cst_31 = arith.constant 1.000000e+00 : f32
      %45 = vector.broadcast %cst_31 : f32 to vector<2x32xf32>
      %46 = arith.addf %45, %44 : vector<2x32xf32>
      %47 = arith.divf %45, %46 : vector<2x32xf32>
      %c0_32 = arith.constant 0 : index
      %c0_33 = arith.constant 0 : index
      %48 = vector.load %arg9[%c0_32, %c0_33] : memref<2x32xf32, #tpu.memory_space<vmem>>, vector<2x32xf32>
      %49 = arith.mulf %39, %48 : vector<2x32xf32>
      %50 = arith.mulf %33, %41 : vector<2x32xf32>
      %51 = arith.addf %49, %50 : vector<2x32xf32>
      %c0_34 = arith.constant 0 : index
      %c0_35 = arith.constant 0 : index
      %52 = vector.load %arg9[%c0_34, %c0_35] : memref<2x32xf32, #tpu.memory_space<vmem>>, vector<2x32xf32>
      tpu.vector_store %arg9[%c0_34, %c0_35], %51 {strides = array<i32>} : memref<2x32xf32, #tpu.memory_space<vmem>>, vector<2x32xf32>,
      %53 = math.tanh %51 : vector<2x32xf32>
      %54 = arith.mulf %47, %53 : vector<2x32xf32>
      %c0_36 = arith.constant 0 : index
      %c0_37 = arith.constant 0 : index
      %55 = vector.load %arg8[%c0_36, %c0_37] : memref<2x32xf32, #tpu.memory_space<vmem>>, vector<2x32xf32>
      tpu.vector_store %arg8[%c0_36, %c0_37], %54 {strides = array<i32>} : memref<2x32xf32, #tpu.memory_space<vmem>>, vector<2x32xf32>,
    }
    %c8_i32_4 = arith.constant 8 : i32
    %c0_5 = arith.constant 0 : index
    %c0_6 = arith.constant 0 : index
    %5 = vector.load %arg8[%c0_5, %c0_6] : memref<2x32xf32, #tpu.memory_space<vmem>>, vector<2x32xf32>
    %c0_7 = arith.constant 0 : index
    %c0_8 = arith.constant 0 : index
    %6 = vector.load %arg5[%c0_7, %c0_8] : memref<32x128xf32, #tpu.memory_space<vmem>>, vector<32x128xf32>
    %cst_9 = arith.constant dense<0.000000e+00> : vector<2x128xf32>
    %7 = tpu.matmul %5, %6, %cst_9 {dimension_numbers = #tpu.dot_dimension_numbers<[1], [0], [0], [1], [0, 0, 1, 1], [], []>} : vector<2x32xf32>, vector<32x128xf32>, vector<2x128xf32> -> vector<2x128xf32>
    %c0_10 = arith.constant 0 : index
    %c0_11 = arith.constant 0 : index
    %8 = vector.load %arg6[%c0_10, %c0_11] : memref<1x128xf32, #tpu.memory_space<vmem>>, vector<1x128xf32>
    %9 = vector.broadcast %8 : vector<1x128xf32> to vector<2x128xf32>
    %10 = arith.addf %7, %9 : vector<2x128xf32>
    %cst_12 = arith.constant 0.000000e+00 : f32
    %11 = vector.broadcast %cst_12 : f32 to vector<2x128xf32>
    %12 = arith.maximumf %10, %11 : vector<2x128xf32>
    %c0_13 = arith.constant 0 : index
    %c0_14 = arith.constant 0 : index
    %13 = vector.load %arg7[%c0_13, %c0_14] : memref<2x128xf32, #tpu.memory_space<vmem>>, vector<2x128xf32>
    tpu.vector_store %arg7[%c0_13, %c0_14], %12 {strides = array<i32>} : memref<2x128xf32, #tpu.memory_space<vmem>>, vector<2x128xf32>,
    return
  }
  func.func @transform_0(%arg0: i32) -> (i32, i32, i32) {
    %c0_i32 = arith.constant 0 : i32
    %c0_i32_0 = arith.constant 0 : i32
    %c0_i32_1 = arith.constant 0 : i32
    %c0_i32_2 = arith.constant 0 : i32
    return %c0_i32, %c0_i32_0, %c0_i32_1 : i32, i32, i32
  }
  func.func @transform_1(%arg0: i32) -> (i32, i32) {
    %c0_i32 = arith.constant 0 : i32
    %c0_i32_0 = arith.constant 0 : i32
    %c0_i32_1 = arith.constant 0 : i32
    return %c0_i32, %c0_i32_0 : i32, i32
  }
  func.func @transform_2(%arg0: i32) -> (i32, i32) {
    %c0_i32 = arith.constant 0 : i32
    %c0_i32_0 = arith.constant 0 : i32
    %c0_i32_1 = arith.constant 0 : i32
    return %c0_i32, %c0_i32_0 : i32, i32
  }
  func.func @transform_3(%arg0: i32) -> (i32, i32) {
    %c0_i32 = arith.constant 0 : i32
    %c0_i32_0 = arith.constant 0 : i32
    %c0_i32_1 = arith.constant 0 : i32
    return %c0_i32, %c0_i32_0 : i32, i32
  }
  func.func @transform_4(%arg0: i32) -> (i32, i32) {
    %c0_i32 = arith.constant 0 : i32
    %c0_i32_0 = arith.constant 0 : i32
    %c0_i32_1 = arith.constant 0 : i32
    return %c0_i32, %c0_i32_0 : i32, i32
  }
  func.func @transform_5(%arg0: i32) -> (i32, i32) {
    %c0_i32 = arith.constant 0 : i32
    %c0_i32_0 = arith.constant 0 : i32
    %c0_i32_1 = arith.constant 0 : i32
    return %c0_i32, %c0_i32_0 : i32, i32
  }
  func.func @transform_6(%arg0: i32) -> (i32, i32) {
    %c0_i32 = arith.constant 0 : i32
    %c0_i32_0 = arith.constant 0 : i32
    %c0_i32_1 = arith.constant 0 : i32
    return %c0_i32, %c0_i32_0 : i32, i32
  }
}

</mosaic_0001>

<bundles_post_ra>
// kernel: r2n_forward.1
= control target key start
LH: loop header
LB: loop body
LE: loop exit
PB: predicated region body
PF: predicated region fallthrough
CT: control target
= control target key end

     0   :  { %11 = vsyncpa [#allocation5], 0  ;;  %vm24_vm0 = vcmask 254976   ;;  %v469_v0 = vmov 0.0   ;;  %s518_s21 = smov 0   ;;  %s583_s0 = inlined_call_operand.vmem [shape: f32[8,2,16], index: 0, kind: input, shape index: {}]   ;;  %s584_s1 = inlined_call_operand.vmem [shape: f32[16,128], index: 1, kind: input, shape index: {}]   ;;  %s585_s2 = inlined_call_operand.vmem [shape: f32[32,128], index: 2, kind: input, shape index: {}]   ;;  %s586_s3 = inlined_call_operand.vmem [shape: f32[1,128], index: 3, kind: input, shape index: {}]   ;;  %s587_s4 = inlined_call_operand.vmem [shape: f32[32,128], index: 4, kind: input, shape index: {}]   ;;  %s588_s5 = inlined_call_operand.vmem [shape: f32[1,128], index: 5, kind: input, shape index: {}]   ;;  %s589_s6 = inlined_call_operand.hbm [shape: f32[2,128], index: 6, kind: output, shape index: {}]  }
   0x1   :  { %25 = vst.msk [vmem:[#allocation2] sm:$0x3] %vm24_vm0, %v469_v0  ;;  %26 = vst.msk [vmem:[#allocation3] sm:$0x3] %vm24_vm0, %v469_v0 }
   0x2 LB: > { %v39_v1 = vld [vmem:[%s585_s2] sm:$0xff]  ;;  %v40_v2 = vld [vmem:[%s585_s2 + $0x8] sm:$0xff]  ;;  %v470_v4 = vmov 0.0|0.0   ;;  %v41_v7 = vld [vmem:[%s585_s2 + $0x10] sm:$0xff]  ;;  %vm471_vm1 = vmmov 0   ;;  %v472_v10 = vmov 0.0   ;;  %s467_s21 = sphi %s518_s21, %s32_s21  }
   0x3   : > { %v37_v3 = vld [vmem:[%s584_s1] sm:$0xff]  ;;  %396 = vmatprep.subr.bf16.mxu0 %v470_v4  ;;  %v397_v5 = vpack.c.bf16 %v40_v2, %v39_v1  ;;  %402 = vmatprep.subr.bf16.mxu1 %v470_v4  ;;  %v38_v6 = vld [vmem:[%s584_s1 + $0x8] sm:$0xff]  ;;  %v42_v8 = vld [vmem:[%s585_s2 + $0x18] sm:$0xff]  ;;  %s347_s10 = sshll.u32 %s467_s21, 1  ;;  %vm117_vm2 = vcmask 130048   ;;  %vm43_vm3 = vcmask 261120  }
   0x4   : > { %v403_v9 = vpack.c.bf16 %v38_v6, %v37_v3  ;;  %382 = vmatprep.mubr.msk.f32.mxu1 %vm471_vm1, %v472_v10  ;;  %375 = vmatprep.mubr.msk.f32.mxu0 %vm471_vm1, %v472_v10  ;;  %v400_v11 = vpack.c.bf16 %v42_v8, %v41_v7  ;;  %s34_s13 = scalar_lea.vmem %s583_s0, %s347_s10  ;;  %v350_v17 = vld [vmem:[%s586_s3] ss:$0 sm:$0xff]  ;;  %s473_s16 = smov 64  }
   0x5   : > { %398 = vmatpush3.bf16.msra.mxu0 %v397_v5  ;;  %v35_v12 = vld [vmem:[%s34_s13] sm:$0x3]  ;;  %s474_s17 = smov 32   ;;  %s475_s18 = smov 96  }
   0x6   : > { %399 = vmatprep.subr.bf16.mxu0 %v470_v4  ;;  %404 = vmatpush3.bf16.msra.mxu1 %v403_v9  ;;  %s32_s21 = sadd.s32 1, %s467_s21  }
   0x7   : > { %p29_p0 = scmp.ge.s32.totalorder %s32_s21, 8  }
   0x8   : > { %v36_v13 = vld [vmem:[#allocation2] sm:$0x3]  ;;  %v206_v22 = vld [vmem:[#allocation3] sm:$0x3]  ;;  %v240_v39 = vld [vmem:[%s587_s4 + $0x8] sm:$0xff] (%p29_p0)  ;;  %v476_v41 = vmov (%p29_p0), 0.0|0.0  }
   0x9   : > { %401 = vmatpush3.bf16.msra.mxu0 %v400_v11  ;;  %383 = vmatmul.mubr.msk.f32.vlgmr.msra.gmra.mrb[0].mxu1 %vm117_vm2, %v35_v12  ;;  %v239_v38 = vld [vmem:[%s587_s4] sm:$0xff] (%p29_p0)  ;;  %v241_v40 = vld [vmem:[%s587_s4 + $0x10] sm:$0xff] (%p29_p0)  ;;  %v242_v43 = vld [vmem:[%s587_s4 + $0x18] sm:$0xff] (%p29_p0)  ;;  %vm477_vm4 = vmmov (%p29_p0), 0   ;;  %s478_s2 = smov (%p29_p0), [#allocation4]  }
   0xa   :  { %405 = vmatprep.subr.bf16.mxu0 (%p29_p0), %v476_v41  ;;  %v406_v42 = vpack.c.bf16 (%p29_p0), %v240_v39, %v239_v38  ;;  %v409_v44 = vpack.c.bf16 (%p29_p0), %v242_v43, %v241_v40  ;;  %v352_v46 = vld [vmem:[%s588_s5] ss:$0 sm:$0xff] (%p29_p0)  ;;  %s332_s3 = sshll.u32 (%p29_p0), %s478_s2, 4  ;;  %s333_s3 = int_to_ptr.vmem [resolvable:$true] %s332_s3 }
   0xb   :  { %s437_s4 = scalar_lea.vmem (%p29_p0), %s333_s3, 32  ;;  %p442_p2 = scmp.lt.s32.totalorder (%p29_p0), %s333_s3, %s333_s3 }
   0xc   : > { %376 = vmatmul.mubr.msk.f32.vlgmr.msra.gmra.mrb[0].mxu0 %vm43_vm3, %v36_v13  ;;  %p438_p1 = scmp.ne.s32.totalorder (%p29_p0), %s333_s3, %s437_s4  ;;  %p443_p3 = scmp.lt.s32.totalorder (%p29_p0), %s437_s4, %s437_s4 }
   0xd   :  { %393 = vmatprep.mubr.msk.f32.mxu0 (%p29_p0), %vm477_vm4, %v469_v0  ;;  %407 = vmatpush3.bf16.msra.mxu0 (%p29_p0), %v406_v42 }
   0xe   :  { %408 = vmatprep.subr.bf16.mxu0 (%p29_p0), %v476_v41  ;;  %p444_p4 = por (%p29_p0), %p443_p3, %p442_p2 }
  0x10   :  { %p445_p5 = pnand (%p29_p0), %p444_p4, %p438_p1 }
  0x11   :  { %410 = vmatpush3.bf16.msra.mxu0 (%p29_p0), %v409_v44 }
  0xdc   : > { %v187_v14 = vpop.f32.mrb[0].mxu1 }
  0xdd   : > { %v384_v15 = vpop.f32.mrb[1].mxu1 }
  0xdf   : > { %v113_v16 = vpop.f32.mrb[0].mxu0 }
  0xe0   : > { %v188_v18 = vadd.f32 %v187_v14, %v113_v16  ;;  %v377_v19 = vpop.f32.mrb[1].mxu0 }
  0xe2   : > { %v198_v20 = vadd.f32 %v350_v17, %v188_v18 }
  0xe4   : > { %429 = vtanh.f32 %v198_v20  ;;  %v351_v23 = vmul.f32 -1.442695, %v198_v20 }
  0xe6   : > { %431 = vpow2.f32 %v351_v23 }
  0xee   : > { %v430_v21 = vpop.eup %429 }
  0xef   : > { %213 = vrot.lane.b32.xlu0 %v430_v21, %s473_s16 }
  0xf0   : > { %v432_v24 = vpop.eup %431 }
  0xf1   : > { %v202_v25 = vadd.f32 1.0, %v432_v24 }
  0xf3   : > { %208 = vrot.lane.b32.xlu0 %v206_v22, %s474_s17  ;;  %433 = vrcp.f32 %v202_v25 }
  0xfd   : > { %v434_v26 = vpop.eup %433 }
 0x161   : > { %v214_v27 = vpop.permute.xlu0 %213 }
 0x162   : > { %v216_v28 = vmul.f32 %v434_v26, %v214_v27 }
 0x164   : > { %218 = vrot.lane.b32.xlu1 %v216_v28, %s474_s17 }
 0x165   : > { %v209_v29 = vpop.permute.xlu0 %208 }
 0x166   : > { %v211_v30 = vmul.f32 %v434_v26, %v209_v29 }
 0x1d6   : > { %v219_v31 = vpop.permute.xlu1 %218 }
 0x1d7   : > { %v221_v32 = vadd.f32 %v219_v31, %v211_v30 }
 0x1d9   : > { %435 = vtanh.f32 %v221_v32  ;;  %223 = vrot.lane.b32.xlu0 %v221_v32, %s475_s18 }
 0x1e3   : > { %v436_v33 = vpop.eup %435 }
 0x1e4   : > { %229 = vrot.lane.b32.xlu1 %v436_v33, %s473_s16 }
 0x24b   : > { %v224_v34 = vpop.permute.xlu0 %223 }
 0x24c   : > { %226 = vst.msk [vmem:[#allocation3] sm:$0x3] %vm24_vm0, %v224_v34 }
 0x256   : > { %v230_v35 = vpop.permute.xlu1 %229 }
 0x257   : > { %v232_v36 = vmul.f32 %v434_v26, %v230_v35 }
 0x259   : > { %234 = vrot.lane.b32.xlu1 %v232_v36, %s474_s17 }
 0x2c6   :  { %31 = sbr.rel (!%p29_p0) target bundleno = 2 (0x2), region = 52 }
 0x2cb   : > { %v235_v37 = vpop.permute.xlu1 %234 }
 0x2cc   : > { %237 = vst.msk [vmem:[#allocation2] sm:$0x3] %vm24_vm0, %v235_v37 }
 0x2d3   :  { %v238_v45 = vld [vmem:[#allocation2] sm:$0x3] }
 0x2d4   :  { %394 = vmatmul.mubr.msk.f32.vlgmr.msra.gmra.mrb[0].mxu0 %vm43_vm3, %v238_v45 }
 0x3a7   :  { %v320_v47 = vpop.f32.mrb[0].mxu0 }
 0x3a8   :  { %v321_v48 = vadd.f32 %v352_v46, %v320_v47  ;;  %v395_v49 = vpop.f32.mrb[1].mxu0 }
 0x3aa   :  { %v324_v50 = vmax.f32 %v321_v48, 0.0 }
 0x3ac   :  { %325 = vst [vmem:[#allocation4] sm:$0x3] %v324_v50 }
 0x3ad   :  { %448 = shalt.err (!%p445_p5)
}
 0x3ae   :  { %s449_s29 = scalar_lea.hbm %s589_s6, 32 }
 0x3af   :  { %p450_p6 = scmp.ne.s32.totalorder %s589_s6, %s449_s29  ;;  %p453_p7 = scmp.lt.u32.totalorder %s449_s29, %s589_s6 }
 0x3b1   :  { %p455_p8 = pnand %p453_p7, %p450_p6 }
 0x3b3   :  { %458 = shalt.err (!%p455_p8)
}
 0x3b4   :  { %335 = dma.vmem_to_hbm [thread:$0]  %s333_s3, 32, %s589_s6, [#allocation5]  }
 0x3b5   :  { %463 = dma.done.wait [#allocation5], 32  }
 0x3b6   :  { %464 = vsyncadd [#allocation5], 4294967264 }
 0x3b7   :  { %339 = vsyncpa [#allocation5], 1 }

</bundles_post_ra>
